<compile_context>
chip_gen: v6e
topology: v6e:2x2x1
jax: 0.10.0
libtpu: 0.0.40
codegen_flags: <defaults>
</compile_context>

<pallas_src>
import functools

import jax
import jax.numpy as jnp
from jax.experimental import pallas as pl
from jax.experimental.pallas import tpu as pltpu


def _prenorm_kernel(*refs, layernorm_type: str):
    """One (C, TN) block: LayerNorm over channels (sublanes), then 1x1 conv."""
    if layernorm_type == "BiasFree":
        x_ref, lnw_ref, fw_ref, fb_ref, o_ref = refs
        lnb_ref = None
    else:  # "WithBias" (and the nn.LayerNorm fallback, which is the same math)
        x_ref, lnw_ref, lnb_ref, fw_ref, fb_ref, o_ref = refs

    x = x_ref[...].astype(jnp.float32)                 # (C, TN)
    inv_c = 1.0 / x.shape[0]

    # Single-pass statistics over the channel (sublane) axis.
    mu = jnp.sum(x, axis=0, keepdims=True) * inv_c     # (1, TN)
    ex2 = jnp.sum(x * x, axis=0, keepdims=True) * inv_c
    var = jnp.maximum(ex2 - mu * mu, 0.0)              # clamp vs. f32 rounding
    inv_sigma = jax.lax.rsqrt(var + 1e-5)

    lnw = lnw_ref[...].astype(jnp.float32)             # (C, 1) -> lane broadcast
    if layernorm_type == "BiasFree":
        # PyTorch BiasFree: var is mean-subtracted, x itself is NOT centered.
        y = x * inv_sigma * lnw
    else:
        y = (x - mu) * inv_sigma * lnw + lnb_ref[...].astype(jnp.float32)

    # fn(x): 1x1 conv over channels == (C_out, C_in) @ (C_in, TN) on the MXU.
    y = y.astype(fw_ref.dtype)
    out = jnp.dot(fw_ref[...], y, preferred_element_type=jnp.float32)
    out = out + fb_ref[...].astype(jnp.float32)        # (C, 1) bias broadcast
    o_ref[...] = out.astype(o_ref.dtype)


def prenorm_pallas(x_nchw, ln_weight, ln_bias, fn_weight, fn_bias,
                   *, layernorm_type="WithBias", lanes_per_block=None):
    """x_nchw: (B, C, H, W).  fn_weight: (C_out, C_in) (PyTorch conv layout).

    Returns (B, C, H, W)."""
    B, C, H, W = x_nchw.shape
    HW = H * W
    itemsize = jnp.dtype(x_nchw.dtype).itemsize

    # Channels on sublanes, spatial on lanes.  Free reshape, no transpose.
    x3d = x_nchw.reshape(B, C, HW)

    # Pick the spatial (lane) tile: big, 128-aligned, VMEM-budgeted.
    if lanes_per_block is None:
        if HW % 128 == 0:
            tn = min(HW, 2048)
            # keep double-buffered (in + out) blocks under ~16 MiB
            while tn > 128 and 4 * C * tn * itemsize > (16 << 20):
                tn //= 2
        else:
            tn = HW  # full-extent lane dim satisfies the (8,128) rule
    else:
        tn = lanes_per_block

    lnw = ln_weight.reshape(C, 1)
    fw = fn_weight.reshape(C, C)          # (C_out, C_in)
    fb = fn_bias.reshape(C, 1)

    grid = (B, pl.cdiv(HW, tn))
    x_spec = pl.BlockSpec((None, C, tn), lambda b, s: (b, 0, s))
    out_spec = pl.BlockSpec((None, C, tn), lambda b, s: (b, 0, s))
    const_map = lambda b, s: (0, 0)

    if layernorm_type == "BiasFree":
        args = (x3d, lnw, fw, fb)
        in_specs = [
            x_spec,
            pl.BlockSpec((C, 1), const_map),   # LN weight
            pl.BlockSpec((C, C), const_map),   # fn weight
            pl.BlockSpec((C, 1), const_map),   # fn bias
        ]
    else:
        lnb = ln_bias.reshape(C, 1)
        args = (x3d, lnw, lnb, fw, fb)
        in_specs = [
            x_spec,
            pl.BlockSpec((C, 1), const_map),   # LN weight
            pl.BlockSpec((C, 1), const_map),   # LN bias
            pl.BlockSpec((C, C), const_map),   # fn weight
            pl.BlockSpec((C, 1), const_map),   # fn bias
        ]

    # VMEM budget: double-buffered in/out x-sized blocks + params + headroom.
    pipeline_bytes = 4 * C * tn * itemsize
    weight_bytes = (C * C + 3 * C) * 4
    vmem_limit = int(min(max(2 * pipeline_bytes + 2 * weight_bytes + (4 << 20),
                             32 << 20),
                         60 << 20))            # stay inside v7x's 64 MiB VMEM

    kernel = functools.partial(_prenorm_kernel, layernorm_type=layernorm_type)

    out3d = pl.pallas_call(
        kernel,
        out_shape=jax.ShapeDtypeStruct((B, C, HW), x_nchw.dtype),
        grid_spec=pltpu.PrefetchScalarGridSpec(
            num_scalar_prefetch=0,
            grid=grid,
            in_specs=in_specs,
            out_specs=out_spec,
        ),
        compiler_params=pltpu.CompilerParams(
            dimension_semantics=("parallel", "parallel"),
            vmem_limit_bytes=vmem_limit),
    )(*args)

    return out3d.reshape(B, C, H, W)


def prenorm_reference(x_nchw, ln_weight, ln_bias, fn_weight, fn_bias,
                      *, layernorm_type="WithBias"):
    """Pure-JAX reference mirroring the PyTorch module (fn = 1x1 conv)."""
    B, C, H, W = x_nchw.shape
    x = jnp.transpose(x_nchw, (0, 2, 3, 1)).reshape(B, H * W, C).astype(jnp.float32)
    mu = jnp.mean(x, axis=-1, keepdims=True)
    var = jnp.mean((x - mu) ** 2, axis=-1, keepdims=True)
    if layernorm_type == "BiasFree":
        y = x / jnp.sqrt(var + 1e-5) * ln_weight
    else:
        y = (x - mu) / jnp.sqrt(var + 1e-5) * ln_weight + ln_bias
    out = y @ fn_weight.T + fn_bias          # fn_weight is (C_out, C_in)
    return jnp.transpose(out.reshape(B, H, W, C), (0, 3, 1, 2)).astype(x_nchw.dtype)


if __name__ == "__main__":
    key = jax.random.PRNGKey(0)
    B, C, H, W = 2, 4, 16, 16   # small NCHW shapes consistent with the module

    kx, kw, kb = jax.random.split(key, 3)
    x = jax.random.normal(kx, (B, C, H, W), dtype=jnp.float32)

    # LayerNorm params: PyTorch init (ones / zeros).
    ln_weight = jnp.ones((C,), jnp.float32)
    ln_bias = jnp.zeros((C,), jnp.float32)
    # fn = 1x1 conv; PyTorch Conv2d weight convention (C_out, C_in).
    fn_weight = jax.random.normal(kw, (C, C), dtype=jnp.float32) * 0.1
    fn_bias = jax.random.normal(kb, (C,), dtype=jnp.float32) * 0.1

    # WithBias path.
    out = prenorm_pallas(x, ln_weight, ln_bias, fn_weight, fn_bias,
                         layernorm_type="WithBias")
    out = jax.block_until_ready(out)
    ref = prenorm_reference(x, ln_weight, ln_bias, fn_weight, fn_bias,
                            layernorm_type="WithBias")
    assert out.shape == (B, C, H, W)
    assert jnp.allclose(out, ref, atol=1e-4, rtol=1e-4), "WithBias mismatch"

    # BiasFree path (no LN bias is passed to / DMA'd by the kernel).
    out_bf = prenorm_pallas(x, ln_weight, ln_bias, fn_weight, fn_bias,
                            layernorm_type="BiasFree")
    out_bf = jax.block_until_ready(out_bf)
    ref_bf = prenorm_reference(x, ln_weight, ln_bias, fn_weight, fn_bias,
                               layernorm_type="BiasFree")
    assert jnp.allclose(out_bf, ref_bf, atol=1e-4, rtol=1e-4), "BiasFree mismatch"

    print("KERNEL_OK")
</pallas_src>

<mosaic_0001>
module attributes {stable_mosaic.version = 11 : i64} {
  func.func @_prenorm_kernel(%arg0: i32, %arg1: i32, %arg2: memref<1x4x256xf32, #tpu.memory_space<vmem>>, %arg3: memref<4x1xf32, #tpu.memory_space<vmem>>, %arg4: memref<4x1xf32, #tpu.memory_space<vmem>>, %arg5: memref<4x4xf32, #tpu.memory_space<vmem>>, %arg6: memref<4x1xf32, #tpu.memory_space<vmem>>, %arg7: memref<1x4x256xf32, #tpu.memory_space<vmem>>) attributes {dimension_semantics = [#tpu.dimension_semantics<parallel>, #tpu.dimension_semantics<parallel>], iteration_bounds = array<i64: 2, 1>, scalar_prefetch = 0 : i64, scratch_operands = 0 : i64, tpu.core_type = #tpu.core_type<tc>, window_params = [{transform_indices = @transform_0, window_bounds = array<i64: 1, 4, 256>}, {pipeline_mode = #tpu.pipeline_mode<synchronous>, transform_indices = @transform_1, window_bounds = array<i64: 4, 1>}, {pipeline_mode = #tpu.pipeline_mode<synchronous>, transform_indices = @transform_2, window_bounds = array<i64: 4, 1>}, {pipeline_mode = #tpu.pipeline_mode<synchronous>, transform_indices = @transform_3, window_bounds = array<i64: 4, 4>}, {pipeline_mode = #tpu.pipeline_mode<synchronous>, transform_indices = @transform_4, window_bounds = array<i64: 4, 1>}, {transform_indices = @transform_5, window_bounds = array<i64: 1, 4, 256>}]} {
    %c0 = arith.constant 0 : index
    %c0_0 = arith.constant 0 : index
    %c0_1 = arith.constant 0 : index
    %0 = vector.load %arg2[%c0, %c0_0, %c0_1] : memref<1x4x256xf32, #tpu.memory_space<vmem>>, vector<1x4x256xf32>
    %1 = vector.shape_cast %0 : vector<1x4x256xf32> to vector<4x256xf32>
    %cst = arith.constant dense<0.000000e+00> : vector<256xf32>
    %2 = vector.multi_reduction <add>, %1, %cst [0] : vector<4x256xf32> to vector<256xf32>
    %3 = vector.shape_cast %2 : vector<256xf32> to vector<1x256xf32>
    %cst_2 = arith.constant 2.500000e-01 : f32
    %4 = vector.broadcast %cst_2 : f32 to vector<1x256xf32>
    %5 = arith.mulf %3, %4 : vector<1x256xf32>
    %6 = arith.mulf %1, %1 : vector<4x256xf32>
    %cst_3 = arith.constant dense<0.000000e+00> : vector<256xf32>
    %7 = vector.multi_reduction <add>, %6, %cst_3 [0] : vector<4x256xf32> to vector<256xf32>
    %8 = vector.shape_cast %7 : vector<256xf32> to vector<1x256xf32>
    %cst_4 = arith.constant 2.500000e-01 : f32
    %9 = vector.broadcast %cst_4 : f32 to vector<1x256xf32>
    %10 = arith.mulf %8, %9 : vector<1x256xf32>
    %11 = arith.mulf %5, %5 : vector<1x256xf32>
    %12 = arith.subf %10, %11 : vector<1x256xf32>
    %cst_5 = arith.constant 0.000000e+00 : f32
    %13 = vector.broadcast %cst_5 : f32 to vector<1x256xf32>
    %14 = arith.maximumf %12, %13 : vector<1x256xf32>
    %cst_6 = arith.constant 9.99999974E-6 : f32
    %15 = vector.broadcast %cst_6 : f32 to vector<1x256xf32>
    %16 = arith.addf %14, %15 : vector<1x256xf32>
    %17 = math.rsqrt %16 : vector<1x256xf32>
    %c0_7 = arith.constant 0 : index
    %c0_8 = arith.constant 0 : index
    %18 = vector.load %arg3[%c0_7, %c0_8] : memref<4x1xf32, #tpu.memory_space<vmem>>, vector<4x1xf32>
    %19 = vector.broadcast %5 : vector<1x256xf32> to vector<4x256xf32>
    %20 = arith.subf %1, %19 : vector<4x256xf32>
    %21 = vector.broadcast %17 : vector<1x256xf32> to vector<4x256xf32>
    %22 = arith.mulf %20, %21 : vector<4x256xf32>
    %23 = vector.broadcast %18 : vector<4x1xf32> to vector<4x256xf32>
    %24 = arith.mulf %22, %23 : vector<4x256xf32>
    %c0_9 = arith.constant 0 : index
    %c0_10 = arith.constant 0 : index
    %25 = vector.load %arg4[%c0_9, %c0_10] : memref<4x1xf32, #tpu.memory_space<vmem>>, vector<4x1xf32>
    %26 = vector.broadcast %25 : vector<4x1xf32> to vector<4x256xf32>
    %27 = arith.addf %24, %26 : vector<4x256xf32>
    %c0_11 = arith.constant 0 : index
    %c0_12 = arith.constant 0 : index
    %28 = vector.load %arg5[%c0_11, %c0_12] : memref<4x4xf32, #tpu.memory_space<vmem>>, vector<4x4xf32>
    %cst_13 = arith.constant dense<0.000000e+00> : vector<4x256xf32>
    %29 = tpu.matmul %28, %27, %cst_13 {dimension_numbers = #tpu.dot_dimension_numbers<[1], [0], [0], [1], [0, 0, 1, 1], [], []>} : vector<4x4xf32>, vector<4x256xf32>, vector<4x256xf32> -> vector<4x256xf32>
    %c0_14 = arith.constant 0 : index
    %c0_15 = arith.constant 0 : index
    %30 = vector.load %arg6[%c0_14, %c0_15] : memref<4x1xf32, #tpu.memory_space<vmem>>, vector<4x1xf32>
    %31 = vector.broadcast %30 : vector<4x1xf32> to vector<4x256xf32>
    %32 = arith.addf %29, %31 : vector<4x256xf32>
    %c0_16 = arith.constant 0 : index
    %c0_17 = arith.constant 0 : index
    %c0_18 = arith.constant 0 : index
    %33 = vector.load %arg7[%c0_16, %c0_17, %c0_18] : memref<1x4x256xf32, #tpu.memory_space<vmem>>, vector<1x4x256xf32>
    %34 = vector.shape_cast %33 : vector<1x4x256xf32> to vector<4x256xf32>
    %35 = vector.shape_cast %32 : vector<4x256xf32> to vector<1x4x256xf32>
    tpu.vector_store %arg7[%c0_16, %c0_17, %c0_18], %35 {strides = array<i32>} : memref<1x4x256xf32, #tpu.memory_space<vmem>>, vector<1x4x256xf32>,
    return
  }
  func.func @transform_0(%arg0: i32, %arg1: i32) -> (i32, i32, i32) {
    %c0_i32 = arith.constant 0 : i32
    %c0_i32_0 = arith.constant 0 : i32
    return %arg0, %c0_i32, %arg1 : i32, i32, i32
  }
  func.func @transform_1(%arg0: i32, %arg1: i32) -> (i32, i32) {
    %c0_i32 = arith.constant 0 : i32
    %c0_i32_0 = arith.constant 0 : i32
    %c0_i32_1 = arith.constant 0 : i32
    return %c0_i32, %c0_i32_0 : i32, i32
  }
  func.func @transform_2(%arg0: i32, %arg1: i32) -> (i32, i32) {
    %c0_i32 = arith.constant 0 : i32
    %c0_i32_0 = arith.constant 0 : i32
    %c0_i32_1 = arith.constant 0 : i32
    return %c0_i32, %c0_i32_0 : i32, i32
  }
  func.func @transform_3(%arg0: i32, %arg1: i32) -> (i32, i32) {
    %c0_i32 = arith.constant 0 : i32
    %c0_i32_0 = arith.constant 0 : i32
    %c0_i32_1 = arith.constant 0 : i32
    return %c0_i32, %c0_i32_0 : i32, i32
  }
  func.func @transform_4(%arg0: i32, %arg1: i32) -> (i32, i32) {
    %c0_i32 = arith.constant 0 : i32
    %c0_i32_0 = arith.constant 0 : i32
    %c0_i32_1 = arith.constant 0 : i32
    return %c0_i32, %c0_i32_0 : i32, i32
  }
  func.func @transform_5(%arg0: i32, %arg1: i32) -> (i32, i32, i32) {
    %c0_i32 = arith.constant 0 : i32
    %c0_i32_0 = arith.constant 0 : i32
    return %arg0, %c0_i32, %arg1 : i32, i32, i32
  }
}

</mosaic_0001>

<bundles_post_ra>
// kernel: tpu_custom_call.1
= control target key start
LH: loop header
LB: loop body
LE: loop exit
PB: predicated region body
PF: predicated region fallthrough
CT: control target
= control target key end

     0   :  { %10 = vsyncpa [#allocation3], 0  ;;  %s937_s0 = inlined_call_operand.hbm [shape: f32[2,4,256], index: 0, kind: input, shape index: {}]   ;;  %s938_s1 = inlined_call_operand.vmem [shape: f32[4,1], index: 1, kind: input, shape index: {}]   ;;  %s939_s2 = inlined_call_operand.vmem [shape: f32[4,1], index: 2, kind: input, shape index: {}]   ;;  %s940_s3 = inlined_call_operand.vmem [shape: f32[4,4], index: 3, kind: input, shape index: {}]   ;;  %s941_s4 = inlined_call_operand.vmem [shape: f32[4,1], index: 4, kind: input, shape index: {}]   ;;  %s942_s5 = inlined_call_operand.hbm [shape: f32[2,4,256], index: 5, kind: output, shape index: {}]  }
   0x1   :  { %12 = vsyncpa [#allocation3 + $0x1], 0 }
   0x2   :  { %13 = vsyncpa [#allocation4], 0 }
   0x3   :  { %15 = vsyncpa [#allocation4 + $0x1], 0  ;;  %s781_s18 = smov 0   ;;  %s783_s19 = smov 0  }
   0x4   :  { %s785_s20 = smov 0   ;;  %s787_s21 = smov 0  }
   0x5   :  { %s789_s22 = smov 0   ;;  %s791_s23 = smov 0  }
   0x6 LB: > { %s544_s24 = sadd.s32 4294967295, %s744_s23   ;;  %s545_s25 = sadd.s32 4294967294, %s744_s23   ;;  %s744_s23 = sphi %s791_s23, %s21_s23   ;;  %s740_s22 = sphi %s789_s22, %s954_s22   ;;  %s736_s21 = sphi %s787_s21, %s953_s21   ;;  %s732_s20 = sphi %s785_s20, %s952_s20   ;;  %s728_s19 = sphi %s783_s19, %s951_s19   ;;  %s724_s18 = sphi %s781_s18, %s950_s18  }
   0x7   : > { %s33_s26 = sadd.s32 1, %s740_s22  ;;  %s42_s27 = sadd.s32 1, %s732_s20 }
   0x8   : > { %p35_p0 = scmp.ge.s32.totalorder %s33_s26, 2  ;;  %p49_p1 = scmp.ne.s32.totalorder %s732_s20, %s728_s19 }
   0x9   : > { %p50_p2 = scmp.eq.s32.totalorder %s744_s23, 0  ;;  %p55_p3 = scmp.ne.s32.totalorder %s728_s19, %s724_s18 }
   0xa   : > { %s956_s26 = smov (%p35_p0, %s33_s26), 0  ;;  %p56_p5 = scmp.eq.s32.totalorder %s544_s24, 0 }
   0xb   : > { %p822_p4 = por %p50_p2, %p49_p1  ;;  %s37_s29 = ssub.s32 %s740_s22, %s956_s26 }
   0xc   : > { %p165_p6 = scmp.eq.s32.totalorder %s544_s24, 1  ;;  %p40_p7 = scmp.eq.s32.totalorder %s37_s29, 0 }
   0xd   : > { %p828_p8 = por %p56_p5, %p55_p3  ;;  %p171_p10 = scmp.eq.s32.totalorder %s545_s25, 1 }
   0xe   : > { %p832_p9 = por %p165_p6, %p49_p1  ;;  %p576_p13 = scmp.lt.s32.totalorder %s744_s23, 2 }
   0xf   : > { %s837_s7 = scalar_select %p40_p7, %s732_s20, %s42_s27  }
  0x10   : > { %p839_p11 = por %p171_p10, %p55_p3  ;;  %s203_s9 = sand.u32 1, %s732_s20  }
  0x11   : > { %s548_s10 = sshll.u32 %s203_s9, 3  ;;  %s562_s11 = sshll.u32 %s740_s22, 7 }
  0x12   : > { %s946_s8 = scalar_select %p839_p11, 1, 0 }
  0x13   : > { %s215_s14 = scalar_lea.hbm %s937_s0, %s562_s11  ;;  %s207_s15 = scalar_lea.vmem [#allocation2], %s548_s10 }
  0x14   : > { %s217_s16 = sshll.u32 %s207_s15, 4  ;;  %p852_p0 = pnand %p576_p13, %p822_p4  ;;  %s218_s16 = int_to_ptr.vmem [resolvable:$true] %s217_s16 }
  0x15   : > { %p551_p1 = scmp.ge.s32.totalorder %s744_s23, 1  ;;  %p222_p2 = scmp.lt.s32.totalorder %s744_s23, 3 }
  0x16   : > { %s204_s24 = scalar_lea.sflag [#allocation3], %s203_s9  ;;  %p638_p3 = pneg %p852_p0 }
  0x17   : > { %s649_s25 = scalar_lea.vmem %s218_s16, 128  ;;  %s746_s27 = smov [#allocation2]  }
  0x18   : > { %p650_p5 = scmp.ne.s32.totalorder %s218_s16, %s649_s25  ;;  %s654_s29 = sshll.u32 %s746_s27, 4  ;;  %s655_s29 = int_to_ptr.vmem [resolvable:$false] %s654_s29 }
  0x19   : > { %s656_s10 = scalar_lea.vmem %s655_s29, 256  ;;  %p657_p10 = scmp.lt.s32.totalorder %s218_s16, %s655_s29 }
  0x1a   : > { %p652_p6 = pnand %p650_p5, %p638_p3  ;;  %p658_p12 = scmp.lt.s32.totalorder %s656_s10, %s649_s25 }
  0x1c   : > { %p653_p7 = pneg %p652_p6  ;;  %p659_p4 = por %p658_p12, %p657_p10 }
  0x1e   : > { %p660_p13 = pnand %p659_p4, %p653_p7 }
  0x20   : > { %663 = shalt.err (!%p660_p13)
}
  0x21   : > { %571 = dma.hbm_to_vmem [thread:$0]  (!%p852_p0), %s215_s14, 128, %s218_s16, %s204_s24  }
  0x22   : > { %p223_p11 = pnand %p551_p1, %p222_p2 }
  0x23   : > { %s867_s28 = sand.u32 (!%p223_p11), 1, %s728_s19  }
  0x24   : > { %226 = sbr.rel (%p223_p11) target bundleno = 392 (0x188), region = 40  ;;  %s552_s9 = sshll.u32 (!%p223_p11), %s867_s28, 3 }
  0x25   : > { %s229_s11 = scalar_lea.sflag (!%p223_p11), [#allocation3], %s867_s28  ;;  %s232_s12 = scalar_lea.vmem (!%p223_p11), [#allocation2], %s552_s9 }
  0x29   : > { %715 = dma.done.wait (%p828_p8), %s229_s11, 128  }
  0x2a   : > { %717 = vsyncadd (%p828_p8), %s229_s11, 4294967168  ;;  %v747_v0 = vmov 0   ;;  %v312_v1 = vld [vmem:[%s938_s1] sm:$0xf]  ;;  %v748_v3 = vmov 0.0   ;;  %vm265_vm0 = vcmask 1043456   ;;  %v330_v51 = vlaneseq }
  0x2b   : > { %629 = vset.pattern.permute.xlu0 %v747_v0  ;;  %630 = vset.pattern.permute.xlu1 %v747_v0  ;;  %v336_v2 = vld [vmem:[%s939_s2] sm:$0xf]  ;;  %v749_v49 = vmov 839922192   ;;  %vm359_vm1 = vcmask 31744   ;;  %s563_s27 = sshll.u32 %s736_s21, 7 }
  0x2c   : > { %325 = vperm.xlu0 %629, %v312_v1   ;;  %431 = vmatprep.mubr.f32.mxu0 %v748_v3  ;;  %v351_v4 = vld [vmem:[%s941_s4] sm:$0xf]  ;;  %v328_v50 = vunpack.c.l.s4 %v749_v49  ;;  %v331_v54 = vshrl.u32 %v330_v51, 7  ;;  %s258_s29 = scalar_lea.vmem [#allocation5], %s552_s9  ;;  %s458_s13 = scalar_lea.hbm %s942_s5, %s563_s27 }
  0x2d   : > { %354 = vperm.xlu1 %630, %v351_v4   ;;  %v261_v5 = vld [vmem:[%s232_s12] sm:$0xff]  ;;  %s460_s10 = sshll.u32 %s258_s29, 4  ;;  %s444_s14 = scalar_lea.sflag [#allocation4], %s867_s28  ;;  %s461_s10 = int_to_ptr.vmem [resolvable:$true] %s460_s10 }
  0x2e   : > { %v263_v6 = vcombine.high %v261_v5, %v261_v5  ;;  %v282_v7 = vmul.f32 %v261_v5, %v261_v5  ;;  %v266_v8 = vsel %vm265_vm0, %v261_v5, 0.0  ;;  %v329_v53 = vunpack.c.0.s8 %v328_v50  ;;  %v350_v4 = vld [vmem:[%s940_s3] sm:$0xf]  ;;  %s664_s15 = scalar_lea.vmem %s461_s10, 128  ;;  %s750_s16 = smov [#allocation5]  }
  0x2f   : > { %v267_v11 = vrot.slane %v266_v8, 4  ;;  %p665_p8 = scmp.ne.s32.totalorder %s461_s10, %s664_s15  ;;  %s668_s21 = sshll.u32 %s750_s16, 4  ;;  %s669_s21 = int_to_ptr.vmem [resolvable:$false] %s668_s21 }
  0x30   : > { %339 = vperm.xlu0 %629, %v336_v2   ;;  %v273_v9 = vsel %vm265_vm0, %v263_v6, 0.0  ;;  %v284_v10 = vcombine.high %v282_v7, %v282_v7  ;;  %v286_v13 = vsel %vm265_vm0, %v282_v7, 0.0  ;;  %v332_v57 = vsub.s32 %v329_v53, %v331_v54  ;;  %s670_s9 = scalar_lea.vmem %s669_s21, 256  ;;  %p671_p0 = scmp.lt.s32.totalorder %s461_s10, %s669_s21 }
  0x31   : > { %v274_v12 = vrot.slane %v273_v9, 4  ;;  %v268_v15 = vadd.f32 %v267_v11, %v266_v8  ;;  %v287_v16 = vrot.slane %v286_v13, 4  ;;  %p666_p11 = pnand %p665_p8, %p832_p9  ;;  %p672_p1 = scmp.lt.s32.totalorder %s670_s9, %s664_s15 }
  0x32   : > { %v293_v14 = vsel %vm265_vm0, %v284_v10, 0.0 }
  0x33   : > { %v275_v17 = vadd.f32 %v274_v12, %v273_v9  ;;  %v294_v18 = vrot.slane %v293_v14, 4  ;;  %v269_v19 = vrot.slane %v268_v15, 2  ;;  %v288_v20 = vadd.f32 %v287_v16, %v286_v13  ;;  %p667_p12 = pneg %p666_p11  ;;  %p673_p2 = por %p672_p1, %p671_p0 }
  0x35   : > { %v276_v21 = vrot.slane %v275_v17, 2  ;;  %v295_v22 = vadd.f32 %v294_v18, %v293_v14  ;;  %v270_v23 = vadd.f32 %v269_v19, %v268_v15  ;;  %v289_v24 = vrot.slane %v288_v20, 2  ;;  %p674_p3 = pnand %p673_p2, %p667_p12 }
  0x37   : > { %v277_v25 = vadd.f32 %v276_v21, %v275_v17  ;;  %v296_v26 = vrot.slane %v295_v22, 2  ;;  %v271_v27 = vrot.slane %v270_v23, 1  ;;  %v290_v28 = vadd.f32 %v289_v24, %v288_v20 }
  0x39   : > { %v278_v29 = vrot.slane %v277_v25, 1  ;;  %v297_v30 = vadd.f32 %v296_v26, %v295_v22  ;;  %v272_v31 = vadd.f32 %v271_v27, %v270_v23  ;;  %v291_v32 = vrot.slane %v290_v28, 1 }
  0x3b   : > { %v279_v33 = vadd.f32 %v278_v29, %v277_v25  ;;  %v298_v34 = vrot.slane %v297_v30, 1  ;;  %v280_v35 = vmul.f32 0.25, %v272_v31  ;;  %v292_v36 = vadd.f32 %v291_v32, %v290_v28 }
  0x3d   : > { %v281_v37 = vmul.f32 0.25, %v279_v33  ;;  %v299_v38 = vadd.f32 %v298_v34, %v297_v30  ;;  %v300_v39 = vmul.f32 0.25, %v292_v36  ;;  %v302_v40 = vmul.f32 %v280_v35, %v280_v35 }
  0x3f   : > { %v301_v41 = vmul.f32 0.25, %v299_v38  ;;  %v303_v42 = vmul.f32 %v281_v37, %v281_v37  ;;  %v304_v43 = vsub.f32 %v300_v39, %v302_v40  ;;  %v315_v55 = vcombine.low %v280_v35, %v281_v37 }
  0x41   : > { %v305_v44 = vsub.f32 %v301_v41, %v303_v42  ;;  %v306_v45 = vmax.f32 %v304_v43, 0.0  ;;  %v317_v58 = vsub.f32 %v261_v5, %v315_v55 }
  0x43   : > { %v307_v46 = vmax.f32 %v305_v44, 0.0  ;;  %v308_v47 = vadd.f32 1e-05, %v306_v45 }
  0x45   : > { %v309_v48 = vadd.f32 1e-05, %v307_v46  ;;  %632 = vrsqrt.f32 %v308_v47 }
  0x47   : > { %634 = vrsqrt.f32 %v309_v48 }
  0x52   : > { %v633_v52 = vpop.eup %632 }
  0x54   : > { %v635_v56 = vpop.eup %634 }
  0x55   : > { %v320_v59 = vcombine.low %v633_v52, %v635_v56 }
  0x57   : > { %v322_v61 = vmul.f32 %v320_v59, %v317_v58 }
  0xa7   : > { %v326_v60 = vpop.permute.xlu0 %325 }
  0xa8   : > { %v333_v62 = vrot.slane %v326_v60, %v332_v57  ;;  %v355_v5 = vpop.permute.xlu1 %354 }
  0xaa   : > { %v335_v0 = vmul.f32 %v333_v62, %v322_v61 }
  0xab   : > { %v340_v63 = vpop.permute.xlu0 %339 }
  0xac   : > { %v347_v1 = vrot.slane %v340_v63, %v332_v57 }
  0xae   : > { %v349_v2 = vadd.f32 %v347_v1, %v335_v0 }
  0xb0   : > { %v358_v3 = vcombine.high %v349_v2, %v349_v2 }
  0xb2   : > { %554 = vmatprep.subr.msk.mxu0 %vm265_vm0, %v358_v3 }
  0xb3   : > { %555 = vmatpush1.msk.msra.mxu0 %vm265_vm0, %v349_v2 }
  0xb4   : > { %556 = vmatmul.mubr.msk.f32.vlgmr.msra.gmra.mxu0 %vm359_vm1, %v350_v4 }
 0x174   : > { %v433_v6 = vpop.f32.mrf.mxu0 }
 0x175   : > { %v434_v8 = vadd.f32 %v433_v6, %v355_v5 }
 0x176   : > { %v435_v7 = vpop.f32.mrf.mxu0 }
 0x177   : > { %v436_v9 = vadd.f32 %v435_v7, %v355_v5 }
 0x179   : > { %v440_v10 = vcombine.low %v434_v8, %v436_v9 }
 0x17b   : > { %442 = vst [vmem:[%s258_s29] sm:$0xff] %v440_v10 }
 0x17c   : > { %677 = shalt.err (!%p674_p3)
}
 0x17d   : > { %s678_s17 = scalar_lea.hbm %s458_s13, 128  ;;  %s682_s30 = scalar_lea.hbm %s942_s5, 256 }
 0x17e   : > { %p679_p5 = scmp.ne.s32.totalorder %s458_s13, %s678_s17  ;;  %p683_p10 = scmp.lt.s32.totalorder %s458_s13, %s942_s5 }
 0x17f   : > { %p684_p4 = scmp.lt.s32.totalorder %s682_s30, %s678_s17 }
 0x180   : > { %p680_p6 = pnand %p679_p5, %p832_p9 }
 0x181   : > { %p685_p13 = por %p684_p4, %p683_p10 }
 0x182   : > { %p681_p7 = pneg %p680_p6 }
 0x184   : > { %p686_p8 = pnand %p685_p13, %p681_p7 }
 0x186   : > { %689 = shalt.err (!%p686_p8)
}
 0x187   : > { %566 = dma.vmem_to_hbm [thread:$0]  (%p832_p9), %s461_s10, 128, %s458_s13, %s444_s14  }
 0x188 PF: > { %s472_s29 = sand.u32 1, %s724_s18   ;;  %p948_p11 = scmp.ne.s32.totalorder %s946_s8, 0 }
 0x189   : > { %p949_p12 = scmp.ge.s32.totalorder %s744_s23, 2  ;;  %s473_s11 = scalar_lea.sflag [#allocation4], %s472_s29 }
 0x18b   : > { %p573_p0 = pnand %p949_p12, %p948_p11 }
 0x18d   : > { %p574_p1 = pneg %p573_p0 }
 0x18f   : > { %719 = dma.done.wait (%p574_p1), %s473_s11, 128  }
 0x190   : > { %721 = vsyncadd (%p574_p1), %s473_s11, 4294967168  ;;  %s21_s23 = sadd.s32 1, %s744_s23   ;;  %s950_s18 = smov %s728_s19 }
 0x191   : > { %p18_p2 = scmp.ge.s32.totalorder %s21_s23, 4   ;;  %s951_s19 = smov %s732_s20 }
 0x192   : > { %s952_s20 = smov %s837_s7  ;;  %s953_s21 = smov %s740_s22 }
 0x193   : > { %s954_s22 = smov %s956_s26  ;;  %20 = sbr.rel (!%p18_p2) target bundleno = 6 (0x6), region = 85 }
 0x198   :  { %478 = vsyncpa [#allocation3], 1 }
 0x199   :  { %480 = vsyncpa [#allocation3 + $0x1], 1 }
 0x19a   :  { %481 = vsyncpa [#allocation4], 1 }
 0x19b   :  { %483 = vsyncpa [#allocation4 + $0x1], 1 }

</bundles_post_ra>
